<compile_context>
chip_gen: v6e
topology: v6e:2x2x1
jax: 0.10.0
libtpu: 0.0.40
codegen_flags: <defaults>
</compile_context>

<pallas_src>
import jax
import jax.numpy as jnp
from jax.experimental import pallas as pl
from jax.experimental.pallas import tpu as pltpu

_LANES = 128
_TARGET_BLOCK_BYTES = 8 * 1024 * 1024   # ~8 MiB input block -> 32 MiB double-buffered in+out
_VMEM_LIMIT_BYTES = 48 * 1024 * 1024    # < 64 MiB (v7x physical), << 128 MiB (v5e/v6e)


def _tanh_kernel(x_ref, o_ref):
    x = x_ref[...].astype(jnp.float32)
    o_ref[...] = jnp.tanh(x).astype(o_ref.dtype)


def _sublane_align(dtype):
    itemsize = jnp.dtype(dtype).itemsize
    return max(8, 32 // itemsize)  # 8 for 4-byte, 16 for 2-byte, 32 for 1-byte dtypes


def _tanh_2d(x2d):
    """tanh over a 2-D array whose last dim is a multiple of 128 (or full)."""
    rows, cols = x2d.shape
    dtype = x2d.dtype
    itemsize = jnp.dtype(dtype).itemsize
    align = _sublane_align(dtype)
    block_elems = max(_TARGET_BLOCK_BYTES // itemsize, _LANES)

    if cols * itemsize * align <= _TARGET_BLOCK_BYTES:
        # Full rows fit: tile only the (sublane) row axis.
        tn = cols
        tm_raw = block_elems // cols
        tm = rows if tm_raw >= rows else max(align, (tm_raw // align) * align)
    else:
        # A single group of `align` rows exceeds the budget: tile the lane axis too.
        tm = rows if rows <= align else align
        tn = max(_LANES, (block_elems // max(tm, 1) // _LANES) * _LANES)

    grid = (pl.cdiv(rows, tm), pl.cdiv(cols, tn))

    return pl.pallas_call(
        _tanh_kernel,
        out_shape=jax.ShapeDtypeStruct((rows, cols), dtype),
        grid_spec=pltpu.PrefetchScalarGridSpec(
            num_scalar_prefetch=0,
            grid=grid,
            in_specs=[pl.BlockSpec((tm, tn), lambda i, j: (i, j))],
            out_specs=pl.BlockSpec((tm, tn), lambda i, j: (i, j)),
        ),
        compiler_params=pltpu.CompilerParams(
            dimension_semantics=("parallel", "parallel"),
            vmem_limit_bytes=_VMEM_LIMIT_BYTES,
        ),
    )(x2d)


def activation_forward(x):
    """Elementwise tanh(x) for an array of any shape (matches nn.Tanh)."""
    orig_shape = x.shape
    n = x.size
    if n == 0:
        return x

    # Lane-friendly layout: tile in place, collapsing only leading dims
    # (no physical relayout copy before/after the pallas_call).
    if x.ndim >= 2 and orig_shape[-1] % _LANES == 0:
        x2d = x.reshape(-1, orig_shape[-1])
        return _tanh_2d(x2d).reshape(orig_shape)

    # Lane-narrow shapes (e.g. (..., 16, 16)): flatten to a lane-dense slab.
    flat = x.reshape(-1)
    n_main = (n // _LANES) * _LANES
    if n_main == 0:
        # Fewer than 128 elements: a kernel launch is pure overhead.
        return jnp.tanh(x)

    # Widest slab width dividing the aligned element count (long unmasked stores).
    width = _LANES
    for w in (8192, 4096, 2048, 1024, 512, 256):
        if n_main % w == 0:
            width = w
            break

    prefix = flat if n_main == n else flat[:n_main]
    main = _tanh_2d(prefix.reshape(n_main // width, width)).reshape(-1)

    if n_main == n:
        out = main
    else:
        # <=127-element tail handled outside the kernel (avoids padding the
        # whole tensor and re-slicing the whole output).
        tail = jnp.tanh(flat[n_main:])
        out = jnp.concatenate([main, tail])
    return out.reshape(orig_shape)


if __name__ == "__main__":
    key = jax.random.PRNGKey(0)
    # Small 4-D input consistent with the module's forward (any shape works).
    x = jax.random.normal(key, (2, 4, 16, 16), dtype=jnp.float32)

    out = jax.block_until_ready(activation_forward(x))

    ref = jnp.tanh(x)
    assert out.shape == x.shape
    assert out.dtype == x.dtype
    assert jnp.allclose(out, ref, atol=1e-6, rtol=1e-6)

    print("KERNEL_OK")
</pallas_src>

<mosaic_0001>
module attributes {stable_mosaic.version = 11 : i64} {
  func.func @_tanh_kernel(%arg0: i32, %arg1: i32, %arg2: memref<1x2048xf32, #tpu.memory_space<vmem>>, %arg3: memref<1x2048xf32, #tpu.memory_space<vmem>>) attributes {dimension_semantics = [#tpu.dimension_semantics<parallel>, #tpu.dimension_semantics<parallel>], iteration_bounds = array<i64: 1, 1>, scalar_prefetch = 0 : i64, scratch_operands = 0 : i64, tpu.core_type = #tpu.core_type<tc>, window_params = [{transform_indices = @transform_0, window_bounds = array<i64: 1, 2048>}, {transform_indices = @transform_1, window_bounds = array<i64: 1, 2048>}]} {
    %c0 = arith.constant 0 : index
    %c0_0 = arith.constant 0 : index
    %0 = vector.load %arg2[%c0, %c0_0] : memref<1x2048xf32, #tpu.memory_space<vmem>>, vector<1x2048xf32>
    %1 = math.tanh %0 : vector<1x2048xf32>
    %c0_1 = arith.constant 0 : index
    %c0_2 = arith.constant 0 : index
    %2 = vector.load %arg3[%c0_1, %c0_2] : memref<1x2048xf32, #tpu.memory_space<vmem>>, vector<1x2048xf32>
    tpu.vector_store %arg3[%c0_1, %c0_2], %1 {strides = array<i32>} : memref<1x2048xf32, #tpu.memory_space<vmem>>, vector<1x2048xf32>,
    return
  }
  func.func @transform_0(%arg0: i32, %arg1: i32) -> (i32, i32) {
    %c0_i32 = arith.constant 0 : i32
    return %arg0, %arg1 : i32, i32
  }
  func.func @transform_1(%arg0: i32, %arg1: i32) -> (i32, i32) {
    %c0_i32 = arith.constant 0 : i32
    return %arg0, %arg1 : i32, i32
  }
}

</mosaic_0001>

<bundles_post_ra>
// kernel: tpu_custom_call.1
= control target key start
LH: loop header
LB: loop body
LE: loop exit
PB: predicated region body
PF: predicated region fallthrough
CT: control target
= control target key end

     0   :  { %6 = vsyncpa [#allocation3], 0  ;;  %s110_s0 = inlined_call_operand.hbm [shape: f32[1,2048], index: 0, kind: input, shape index: {}]   ;;  %s111_s1 = inlined_call_operand.hbm [shape: f32[1,2048], index: 1, kind: output, shape index: {}]  }
   0x1   :  { %7 = vsyncpa [#allocation4], 0  ;;  %s92_s6 = smov [#allocation2]  }
   0x2   :  { %s14_s7 = sshll.u32 %s92_s6, 4  ;;  %s15_s7 = int_to_ptr.vmem [resolvable:$true] %s14_s7 }
   0x3   :  { %s56_s8 = scalar_lea.vmem %s15_s7, 256  ;;  %p61_p1 = scmp.lt.s32.totalorder %s15_s7, %s15_s7 }
   0x4   :  { %p57_p0 = scmp.ne.s32.totalorder %s15_s7, %s56_s8  ;;  %p62_p2 = scmp.lt.s32.totalorder %s56_s8, %s56_s8 }
   0x6   :  { %p63_p3 = por %p62_p2, %p61_p1 }
   0x8   :  { %p64_p4 = pnand %p63_p3, %p57_p0 }
   0xa   :  { %67 = shalt.err (!%p64_p4)
}
   0xb   :  { %17 = dma.hbm_to_vmem [thread:$0]  %s110_s0, 256, %s15_s7, [#allocation3]  }
   0xc   :  { %88 = dma.done.wait [#allocation3], 256  }
   0xd   :  { %89 = vsyncadd [#allocation3], 4294967040  ;;  %v21_v0 = vld [vmem:[#allocation2] sm:$0xff]  ;;  %v22_v1 = vld [vmem:[#allocation2 + $0x8] sm:$0xff]  ;;  %s93_s11 = smov [#allocation5]  }
   0xe   :  { %44 = vtanh.f32 %v21_v0  ;;  %s33_s12 = sshll.u32 %s93_s11, 4  ;;  %s34_s12 = int_to_ptr.vmem [resolvable:$true] %s33_s12 }
   0xf   :  { %46 = vtanh.f32 %v22_v1  ;;  %s68_s13 = scalar_lea.vmem %s34_s12, 256  ;;  %p73_p6 = scmp.lt.s32.totalorder %s34_s12, %s34_s12 }
  0x10   :  { %p69_p5 = scmp.ne.s32.totalorder %s34_s12, %s68_s13  ;;  %p74_p7 = scmp.lt.s32.totalorder %s68_s13, %s68_s13 }
  0x12   :  { %p75_p8 = por %p74_p7, %p73_p6 }
  0x14   :  { %p76_p9 = pnand %p75_p8, %p69_p5 }
  0x1b   :  { %v45_v2 = vpop.eup %44 }
  0x1c   :  { %v47_v3 = vpop.eup %46  ;;  %25 = vst [vmem:[#allocation5] sm:$0xff] %v45_v2 }
  0x1d   :  { %26 = vst [vmem:[#allocation5 + $0x8] sm:$0xff] %v47_v3 }
  0x1e   :  { %79 = shalt.err (!%p76_p9)
}
  0x1f   :  { %36 = dma.vmem_to_hbm [thread:$0]  %s34_s12, 256, %s111_s1, [#allocation4]  }
  0x20   :  { %90 = dma.done.wait [#allocation4], 256  }
  0x21   :  { %91 = vsyncadd [#allocation4], 4294967040 }
  0x22   :  { %40 = vsyncpa [#allocation3], 1 }
  0x23   :  { %41 = vsyncpa [#allocation4], 1 }

</bundles_post_ra>
